<compile_context>
chip_gen: v6e
topology: v6e:2x2x1
jax: 0.10.0
libtpu: 0.0.40
codegen_flags: <defaults>
</compile_context>

<pallas_src>
import math
import functools

import jax
import jax.numpy as jnp
from jax import lax
from jax.experimental import pallas as pl
from jax.experimental.pallas import tpu as pltpu


# -----------------------------------------------------------------------------
# Scoped-VMEM budget: ~75% of physical per-core VMEM, capped at 100 MiB.
# (v5e/v6e -> 96 MiB, v7x -> 48 MiB; conservative 48 MiB fallback.)
# -----------------------------------------------------------------------------
def _scoped_vmem_limit():
    try:
        cap = int(pltpu.get_tpu_info().vmem_capacity_bytes)
    except Exception:
        cap = 64 * 1024 * 1024
    return int(min(cap * 3 // 4, 100 * 1024 * 1024))


VMEM_LIMIT = _scoped_vmem_limit()
EMBED_LOOKAHEAD = 8  # DMA lookahead (semaphore ring size) for the row gather


# -----------------------------------------------------------------------------
# In-kernel helpers
# -----------------------------------------------------------------------------
def _matmul_t(x, w):
    """x (M, K) @ w (N, K)^T without a transpose: contract the shared K axis.

    Operands are expected in bf16; accumulation is f32.
    """
    return lax.dot_general(
        x, w, dimension_numbers=(((1,), (1,)), ((), ())),
        preferred_element_type=jnp.float32)


def _layernorm(x, g, b, eps=1e-5):
    # f32 throughout (reference LayerNorm computes in float()).
    mean = jnp.mean(x, axis=-1, keepdims=True)
    var = jnp.mean(jnp.square(x - mean), axis=-1, keepdims=True)
    return (x - mean) * lax.rsqrt(var + eps) * g + b


def _gelu_tanh(x):
    # tanh-form GELU (EUP-friendly). ~1e-3 abs deviation from exact erf GELU.
    c = math.sqrt(2.0 / math.pi)
    return 0.5 * x * (1.0 + jnp.tanh(c * (x + 0.044715 * x * x * x)))


def _mha(q_in, kv_in, wq, wk, wv, wo, *, n_head, causal):
    """Multi-head attention for one batch element; lane-dense (Sq, D) output.

    q_in/kv_in: f32 (already layer-normed).  wq/wk/wv/wo: bf16 (out, in) layout.
    """
    q_in16 = q_in.astype(jnp.bfloat16)
    kv_in16 = kv_in.astype(jnp.bfloat16)
    q = _matmul_t(q_in16, wq)        # (Sq, D) f32
    k = _matmul_t(kv_in16, wk)       # (Sk, D) f32
    v = _matmul_t(kv_in16, wv)       # (Sk, D) f32

    sq, d = q.shape
    sk = k.shape[0]
    dk = d // n_head

    # Scale only q (same math as scaling q and k by dk**-0.25); done once.
    q = q * (float(dk) ** -0.5)
    q16 = q.astype(jnp.bfloat16)
    k16 = k.astype(jnp.bfloat16)
    v16 = v.astype(jnp.bfloat16)

    # Causal mask built ONCE (hoisted out of the per-head loop).
    if causal:
        row = lax.broadcasted_iota(jnp.int32, (sq, sk), 0)
        col = lax.broadcasted_iota(jnp.int32, (sq, sk), 1)
        neg = jnp.where(col > row, jnp.float32(-1e30), jnp.float32(0.0))

    ctxs = []
    for h in range(n_head):
        lo = h * dk
        hi = lo + dk
        qh = q16[:, lo:hi]
        kh = k16[:, lo:hi]
        vh = v16[:, lo:hi]
        # scores: contract dk of both operands (no transpose).
        s = lax.dot_general(qh, kh, (((1,), (1,)), ((), ())),
                            preferred_element_type=jnp.float32)   # (Sq, Sk) f32
        if causal:
            s = s + neg
        s = s - jnp.max(s, axis=-1, keepdims=True)
        e = jnp.exp(s)
        w = e / jnp.sum(e, axis=-1, keepdims=True)                # exact softmax
        ctxs.append(jnp.dot(w.astype(jnp.bfloat16), vh,
                            preferred_element_type=jnp.float32))  # (Sq, dk) f32
    ctx = jnp.concatenate(ctxs, axis=-1)                          # (Sq, D) f32
    return _matmul_t(ctx.astype(jnp.bfloat16), wo)                # (Sq, D) f32


# -----------------------------------------------------------------------------
# Kernels
# -----------------------------------------------------------------------------
def embed_kernel(ids_ref, emb_hbm, pe_ref, o_ref, rows, sems, *,
                 scale, seq_len, lookahead):
    """DMA row-gather of token embeddings (bounded semaphore ring), then
    scale by sqrt(d_model) and add the positional encoding."""
    b = pl.program_id(0)

    def start_row(s, slot):
        tok = ids_ref[b * seq_len + s]
        pltpu.make_async_copy(emb_hbm.at[pl.ds(tok, 1)],
                              rows.at[pl.ds(s, 1)],
                              sems.at[slot]).start()

    # Prime the lookahead window (static, small unroll).
    for s0 in range(lookahead):
        start_row(s0, s0)

    def body(s, carry):
        slot = s % lookahead
        # Wait for row s (same transfer size; static src slice avoids an SMEM
        # read after the wait).
        pltpu.make_async_copy(emb_hbm.at[pl.ds(0, 1)],
                              rows.at[pl.ds(s, 1)],
                              sems.at[slot]).wait()

        @pl.when(s + lookahead < seq_len)
        def _():
            start_row(s + lookahead, slot)

        return carry

    lax.fori_loop(0, seq_len, body, 0)
    o_ref[...] = rows[...] * scale + pe_ref[...]


def self_attn_block_kernel(x_ref, g_ref, b_ref, wq_ref, wk_ref, wv_ref, wo_ref,
                           o_ref, *, n_head):
    x = x_ref[...]                                                 # (S, D) f32
    xn = _layernorm(x, g_ref[...], b_ref[...])
    o_ref[...] = x + _mha(xn, xn, wq_ref[...], wk_ref[...], wv_ref[...],
                          wo_ref[...], n_head=n_head, causal=True)


def cross_attn_block_kernel(x_ref, xa_ref, g_ref, b_ref, wq_ref, wk_ref, wv_ref,
                            wo_ref, o_ref, *, n_head):
    x = x_ref[...]                                                 # (S, D) f32
    xn = _layernorm(x, g_ref[...], b_ref[...])
    o_ref[...] = x + _mha(xn, xa_ref[...], wq_ref[...], wk_ref[...], wv_ref[...],
                          wo_ref[...], n_head=n_head, causal=False)


def mlp_block_kernel(x_ref, g_ref, b_ref, w1_ref, b1_ref, w2_ref, b2_ref, o_ref):
    x = x_ref[...]                                                 # (tm, D) f32
    xn = _layernorm(x, g_ref[...], b_ref[...])
    h = _gelu_tanh(_matmul_t(xn.astype(jnp.bfloat16), w1_ref[...]) + b1_ref[...])
    o_ref[...] = x + _matmul_t(h.astype(jnp.bfloat16), w2_ref[...]) + b2_ref[...]


def ln_logits_kernel(x_ref, g_ref, b_ref, emb_ref, o_ref, xn_scr):
    # LayerNorm computed ONCE per row tile (vocab axis is the inner grid axis).
    @pl.when(pl.program_id(1) == 0)
    def _():
        xn = _layernorm(x_ref[...], g_ref[...], b_ref[...])        # (tm, D) f32
        xn_scr[...] = xn.astype(jnp.bfloat16)
    o_ref[...] = _matmul_t(xn_scr[...], emb_ref[...])              # (tm, tn) f32


# -----------------------------------------------------------------------------
# Tile pickers (lane-dense last dim; second-to-last a multiple of 8)
# -----------------------------------------------------------------------------
def _pick_row_tile(m, target=256):
    if m % 8 != 0:
        return m
    cap = max(8, min(target, m // 2 if m >= 16 else m))
    best = None
    t = 8
    while t <= cap:
        if m % t == 0:
            best = t
        t += 8
    return best if best is not None else m


def _pick_col_tile(v, target=1024):
    if v % 128 != 0:
        return v                      # full last dim
    best = 128
    t = 128
    while t <= min(target, v):
        if v % t == 0:
            best = t
        t += 128
    return best


# -----------------------------------------------------------------------------
# Pallas wrappers
# -----------------------------------------------------------------------------
def pallas_embed(tokens, emb, pe, d_model):
    B, S = tokens.shape
    V, D = emb.shape
    lookahead = min(EMBED_LOOKAHEAD, S)
    kernel = functools.partial(embed_kernel, scale=math.sqrt(d_model),
                               seq_len=S, lookahead=lookahead)
    return pl.pallas_call(
        kernel,
        out_shape=jax.ShapeDtypeStruct((B, S, D), jnp.float32),
        grid_spec=pltpu.PrefetchScalarGridSpec(
            num_scalar_prefetch=1,
            grid=(B,),
            in_specs=[pl.BlockSpec(memory_space=pl.ANY),               # emb in HBM
                      pl.BlockSpec((S, D), lambda b, ids: (0, 0))],    # pe reused
            out_specs=pl.BlockSpec((None, S, D), lambda b, ids: (b, 0, 0)),
            scratch_shapes=[pltpu.VMEM((S, D), jnp.float32),
                            pltpu.SemaphoreType.DMA((lookahead,))]),
        compiler_params=pltpu.CompilerParams(
            dimension_semantics=("parallel",), vmem_limit_bytes=VMEM_LIMIT),
        cost_estimate=pl.CostEstimate(
            flops=0, transcendentals=0,
            bytes_accessed=int(B * S * D * 4 * 3)),
    )(tokens.reshape(-1).astype(jnp.int32), emb, pe)


def _attn_specs(D):
    ln_spec = pl.BlockSpec((1, D), lambda b: (0, 0))
    w_spec = pl.BlockSpec((D, D), lambda b: (0, 0))
    return ln_spec, w_spec


def pallas_self_attn_block(x, ln_p, attn_p, n_head):
    B, S, D = x.shape
    ln_spec, w_spec = _attn_specs(D)
    kernel = functools.partial(self_attn_block_kernel, n_head=n_head)
    flops = B * (4 * 2 * S * D * D + 2 * 2 * S * S * D)
    bytes_acc = 2 * B * S * D * 4 + 4 * D * D * 2 + 4 * D
    return pl.pallas_call(
        kernel,
        out_shape=jax.ShapeDtypeStruct((B, S, D), jnp.float32),
        grid=(B,),
        in_specs=[pl.BlockSpec((None, S, D), lambda b: (b, 0, 0)),
                  ln_spec, ln_spec, w_spec, w_spec, w_spec, w_spec],
        out_specs=pl.BlockSpec((None, S, D), lambda b: (b, 0, 0)),
        compiler_params=pltpu.CompilerParams(
            dimension_semantics=("parallel",), vmem_limit_bytes=VMEM_LIMIT),
        cost_estimate=pl.CostEstimate(flops=int(flops),
                                      transcendentals=int(B * n_head * S * S),
                                      bytes_accessed=int(bytes_acc)),
    )(x, ln_p['g'].reshape(1, D), ln_p['b'].reshape(1, D),
      attn_p['q'], attn_p['k'], attn_p['v'], attn_p['o'])


def pallas_cross_attn_block(x, xa, ln_p, attn_p, n_head):
    B, S, D = x.shape
    Sk = xa.shape[1]
    ln_spec, w_spec = _attn_specs(D)
    kernel = functools.partial(cross_attn_block_kernel, n_head=n_head)
    flops = B * (2 * 2 * S * D * D + 2 * 2 * Sk * D * D + 2 * 2 * S * Sk * D)
    bytes_acc = 2 * B * S * D * 4 + B * Sk * D * 4 + 4 * D * D * 2 + 4 * D
    return pl.pallas_call(
        kernel,
        out_shape=jax.ShapeDtypeStruct((B, S, D), jnp.float32),
        grid=(B,),
        in_specs=[pl.BlockSpec((None, S, D), lambda b: (b, 0, 0)),
                  pl.BlockSpec((None, Sk, D), lambda b: (b, 0, 0)),
                  ln_spec, ln_spec, w_spec, w_spec, w_spec, w_spec],
        out_specs=pl.BlockSpec((None, S, D), lambda b: (b, 0, 0)),
        compiler_params=pltpu.CompilerParams(
            dimension_semantics=("parallel",), vmem_limit_bytes=VMEM_LIMIT),
        cost_estimate=pl.CostEstimate(flops=int(flops),
                                      transcendentals=int(B * n_head * S * Sk),
                                      bytes_accessed=int(bytes_acc)),
    )(x, xa, ln_p['g'].reshape(1, D), ln_p['b'].reshape(1, D),
      attn_p['q'], attn_p['k'], attn_p['v'], attn_p['o'])


def pallas_mlp_block(x, ln_p, mlp_p):
    B, S, D = x.shape
    M = B * S
    Dff = mlp_p['w1'].shape[0]
    tm = _pick_row_tile(M)
    flops = 2 * 2 * M * Dff * D
    bytes_acc = 2 * M * D * 4 + 2 * Dff * D * 2 + (Dff + 3 * D) * 4
    # TODO(synk): tile the Dff axis (arbitrary grid axis + accumulator) for very
    # large D on v7x; bf16 weights keep W1+W2 residency modest at typical sizes.
    y = pl.pallas_call(
        mlp_block_kernel,
        out_shape=jax.ShapeDtypeStruct((M, D), jnp.float32),
        grid=(M // tm,),
        in_specs=[pl.BlockSpec((tm, D), lambda i: (i, 0)),
                  pl.BlockSpec((1, D), lambda i: (0, 0)),
                  pl.BlockSpec((1, D), lambda i: (0, 0)),
                  pl.BlockSpec((Dff, D), lambda i: (0, 0)),
                  pl.BlockSpec((1, Dff), lambda i: (0, 0)),
                  pl.BlockSpec((D, Dff), lambda i: (0, 0)),
                  pl.BlockSpec((1, D), lambda i: (0, 0))],
        out_specs=pl.BlockSpec((tm, D), lambda i: (i, 0)),
        compiler_params=pltpu.CompilerParams(
            dimension_semantics=("parallel",), vmem_limit_bytes=VMEM_LIMIT),
        cost_estimate=pl.CostEstimate(flops=int(flops),
                                      transcendentals=int(M * Dff),
                                      bytes_accessed=int(bytes_acc)),
    )(x.reshape(M, D),
      ln_p['g'].reshape(1, D), ln_p['b'].reshape(1, D),
      mlp_p['w1'], mlp_p['b1'].reshape(1, Dff),
      mlp_p['w2'], mlp_p['b2'].reshape(1, D))
    return y.reshape(B, S, D)


def pallas_ln_logits(x, ln_p, emb_bf16):
    B, S, D = x.shape
    M = B * S
    V = emb_bf16.shape[0]
    tm = _pick_row_tile(M)
    tn = _pick_col_tile(V)
    flops = 2 * M * V * D
    bytes_acc = M * D * 4 + V * D * 2 + M * V * 4
    out = pl.pallas_call(
        ln_logits_kernel,
        out_shape=jax.ShapeDtypeStruct((M, V), jnp.float32),
        grid=(M // tm, V // tn),
        in_specs=[pl.BlockSpec((tm, D), lambda i, j: (i, 0)),
                  pl.BlockSpec((1, D), lambda i, j: (0, 0)),
                  pl.BlockSpec((1, D), lambda i, j: (0, 0)),
                  pl.BlockSpec((tn, D), lambda i, j: (j, 0))],
        out_specs=pl.BlockSpec((tm, tn), lambda i, j: (i, j)),
        scratch_shapes=[pltpu.VMEM((tm, D), jnp.bfloat16)],
        compiler_params=pltpu.CompilerParams(
            dimension_semantics=("parallel", "arbitrary"),
            vmem_limit_bytes=VMEM_LIMIT),
        cost_estimate=pl.CostEstimate(flops=int(flops), transcendentals=0,
                                      bytes_accessed=int(bytes_acc)),
    )(x.reshape(M, D), ln_p['g'].reshape(1, D), ln_p['b'].reshape(1, D), emb_bf16)
    return out.reshape(B, S, V)


# -----------------------------------------------------------------------------
# Model glue
# -----------------------------------------------------------------------------
def make_pe(seq_len, d_model):
    position = jnp.arange(seq_len, dtype=jnp.float32)[:, None]
    div_term = jnp.exp(jnp.arange(0, d_model, 2, dtype=jnp.float32)
                       * (-math.log(10000.0) / d_model))
    pe = jnp.zeros((seq_len, d_model), jnp.float32)
    pe = pe.at[:, 0::2].set(jnp.sin(position * div_term))
    pe = pe.at[:, 1::2].set(jnp.cos(position * div_term))
    return pe


def prepare_params(params):
    """One-time bf16 cast of all matmul weights (LN params / biases stay f32)."""
    def cast_attn(p):
        return {k: p[k].astype(jnp.bfloat16) for k in ('q', 'k', 'v', 'o')}

    def cast_mlp(p):
        return {'w1': p['w1'].astype(jnp.bfloat16), 'b1': p['b1'],
                'w2': p['w2'].astype(jnp.bfloat16), 'b2': p['b2']}

    blocks = [{'attn': cast_attn(bp['attn']), 'attn_ln': bp['attn_ln'],
               'cross_attn': cast_attn(bp['cross_attn']),
               'cross_attn_ln': bp['cross_attn_ln'],
               'mlp': cast_mlp(bp['mlp']), 'mlp_ln': bp['mlp_ln']}
              for bp in params['blocks']]
    return {'emb': params['emb'],                               # f32 for the gather
            'emb_bf16': params['emb'].astype(jnp.bfloat16),     # bf16 for logits
            'blocks': blocks,
            'ln': params['ln']}


def decoder_forward(tokens, xa, params, cfg):
    B, S = tokens.shape
    D = cfg['d_model']
    H = cfg['n_head']
    pe = make_pe(cfg['max_seq_len'], D)[:S]                     # (S, D)
    x = pallas_embed(tokens, params['emb'], pe, D)              # (B, S, D) f32
    for bp in params['blocks']:
        x = pallas_self_attn_block(x, bp['attn_ln'], bp['attn'], H)           # causal
        x = pallas_cross_attn_block(x, xa, bp['cross_attn_ln'], bp['cross_attn'], H)
        x = pallas_mlp_block(x, bp['mlp_ln'], bp['mlp'])
    logits = pallas_ln_logits(x, params['ln'], params['emb_bf16'])  # (B, S, V)
    return logits.astype(jnp.float32)


# -----------------------------------------------------------------------------
# Deterministic parameter init (shapes dictated by the module __init__)
# -----------------------------------------------------------------------------
def init_params(key, cfg):
    V, D, L = cfg['vocab_size'], cfg['d_model'], cfg['n_layers']
    keys = iter(jax.random.split(key, 4096))

    def w(shape, scale=0.02):
        return jax.random.normal(next(keys), shape, jnp.float32) * scale

    def ln_p(d):
        return {'g': jnp.ones((d,), jnp.float32), 'b': jnp.zeros((d,), jnp.float32)}

    def attn_p():
        return {'q': w((D, D)), 'k': w((D, D)), 'v': w((D, D)), 'o': w((D, D))}

    def mlp_p():
        return {'w1': w((4 * D, D)), 'b1': jnp.zeros((4 * D,), jnp.float32),
                'w2': w((D, 4 * D)), 'b2': jnp.zeros((D,), jnp.float32)}

    def block_p():
        return {'attn': attn_p(), 'attn_ln': ln_p(D),
                'cross_attn': attn_p(), 'cross_attn_ln': ln_p(D),
                'mlp': mlp_p(), 'mlp_ln': ln_p(D)}

    return {'emb': w((V, D)),
            'blocks': [block_p() for _ in range(L)],
            'ln': ln_p(D)}


# -----------------------------------------------------------------------------
if __name__ == "__main__":
    cfg = dict(vocab_size=64, max_seq_len=8, d_model=32, n_head=4, n_layers=2)
    B = 2
    S_enc = cfg['max_seq_len']

    key = jax.random.PRNGKey(0)
    pkey, ykey, xakey = jax.random.split(key, 3)
    params = prepare_params(init_params(pkey, cfg))

    y_tokens = jax.random.randint(ykey, (B, cfg['max_seq_len']), 0,
                                  cfg['vocab_size'], dtype=jnp.int32)
    xa = jax.random.normal(xakey, (B, S_enc, cfg['d_model']), jnp.float32)

    logits = decoder_forward(y_tokens, xa, params, cfg)
    jax.block_until_ready(logits)
    assert logits.shape == (B, cfg['max_seq_len'], cfg['vocab_size'])
    assert logits.dtype == jnp.float32
    assert bool(jnp.all(jnp.isfinite(logits)))
    print("KERNEL_OK")
</pallas_src>

<mosaic_0001>
module attributes {stable_mosaic.version = 11 : i64} {
  func.func @embed_kernel(%arg0: i32, %arg1: memref<16xi32, #tpu.memory_space<smem>>, %arg2: memref<64x32xf32, #tpu.memory_space<any>>, %arg3: memref<8x32xf32, #tpu.memory_space<vmem>>, %arg4: memref<1x8x32xf32, #tpu.memory_space<vmem>>, %arg5: memref<8x32xf32, #tpu.memory_space<vmem>>, %arg6: memref<8x!tpu.dma_semaphore, #tpu.memory_space<semaphore_mem>>) attributes {dimension_semantics = [#tpu.dimension_semantics<parallel>], iteration_bounds = array<i64: 2>, scalar_prefetch = 1 : i64, scratch_operands = 2 : i64, tpu.core_type = #tpu.core_type<tc>, window_params = [{}, {pipeline_mode = #tpu.pipeline_mode<synchronous>, transform_indices = @transform_1, window_bounds = array<i64: 8, 32>}, {transform_indices = @transform_2, window_bounds = array<i64: 1, 8, 32>}]} {
    %c8_i32 = arith.constant 8 : i32
    %0 = arith.muli %arg0, %c8_i32 : i32
    %c0_i32 = arith.constant 0 : i32
    %1 = arith.addi %0, %c0_i32 : i32
    %2 = arith.index_cast %1 : i32 to index
    %3 = memref.load %arg1[%2] : memref<16xi32, #tpu.memory_space<smem>>
    %c0_i32_0 = arith.constant 0 : i32
    %c0_i32_1 = arith.constant 0 : i32
    %4 = tpu.memref_slice %arg2[%3, %c0_i32_1] : memref<64x32xf32, #tpu.memory_space<any>> -> memref<1x32xf32, #tpu.memory_space<any>>
    %c0_i32_2 = arith.constant 0 : i32
    %c0_i32_3 = arith.constant 0 : i32
    %5 = tpu.memref_slice %arg5[%c0_i32_2, %c0_i32_3] : memref<8x32xf32, #tpu.memory_space<vmem>> -> memref<1x32xf32, #tpu.memory_space<vmem>>
    %6 = tpu.memref_slice %arg6[%c0_i32_0] : memref<8x!tpu.dma_semaphore, #tpu.memory_space<semaphore_mem>> -> memref<1x!tpu.dma_semaphore, #tpu.memory_space<semaphore_mem>>
    %7 = tpu.memref_squeeze %6 : memref<1x!tpu.dma_semaphore, #tpu.memory_space<semaphore_mem>> -> memref<!tpu.dma_semaphore, #tpu.memory_space<semaphore_mem>>
    tpu.enqueue_dma source(%4 : memref<1x32xf32, #tpu.memory_space<any>>) target(%5 : memref<1x32xf32, #tpu.memory_space<vmem>>) target_semaphore(%7 : memref<!tpu.dma_semaphore, #tpu.memory_space<semaphore_mem>>)
    %c8_i32_4 = arith.constant 8 : i32
    %8 = arith.muli %arg0, %c8_i32_4 : i32
    %c1_i32 = arith.constant 1 : i32
    %9 = arith.addi %8, %c1_i32 : i32
    %10 = arith.index_cast %9 : i32 to index
    %11 = memref.load %arg1[%10] : memref<16xi32, #tpu.memory_space<smem>>
    %c1_i32_5 = arith.constant 1 : i32
    %c0_i32_6 = arith.constant 0 : i32
    %12 = tpu.memref_slice %arg2[%11, %c0_i32_6] : memref<64x32xf32, #tpu.memory_space<any>> -> memref<1x32xf32, #tpu.memory_space<any>>
    %c1_i32_7 = arith.constant 1 : i32
    %c0_i32_8 = arith.constant 0 : i32
    %13 = tpu.memref_slice %arg5[%c1_i32_7, %c0_i32_8] : memref<8x32xf32, #tpu.memory_space<vmem>> -> memref<1x32xf32, #tpu.memory_space<vmem>>
    %14 = tpu.memref_slice %arg6[%c1_i32_5] : memref<8x!tpu.dma_semaphore, #tpu.memory_space<semaphore_mem>> -> memref<1x!tpu.dma_semaphore, #tpu.memory_space<semaphore_mem>>
    %15 = tpu.memref_squeeze %14 : memref<1x!tpu.dma_semaphore, #tpu.memory_space<semaphore_mem>> -> memref<!tpu.dma_semaphore, #tpu.memory_space<semaphore_mem>>
    tpu.enqueue_dma source(%12 : memref<1x32xf32, #tpu.memory_space<any>>) target(%13 : memref<1x32xf32, #tpu.memory_space<vmem>>) target_semaphore(%15 : memref<!tpu.dma_semaphore, #tpu.memory_space<semaphore_mem>>)
    %c8_i32_9 = arith.constant 8 : i32
    %16 = arith.muli %arg0, %c8_i32_9 : i32
    %c2_i32 = arith.constant 2 : i32
    %17 = arith.addi %16, %c2_i32 : i32
    %18 = arith.index_cast %17 : i32 to index
    %19 = memref.load %arg1[%18] : memref<16xi32, #tpu.memory_space<smem>>
    %c2_i32_10 = arith.constant 2 : i32
    %c0_i32_11 = arith.constant 0 : i32
    %20 = tpu.memref_slice %arg2[%19, %c0_i32_11] : memref<64x32xf32, #tpu.memory_space<any>> -> memref<1x32xf32, #tpu.memory_space<any>>
    %c2_i32_12 = arith.constant 2 : i32
    %c0_i32_13 = arith.constant 0 : i32
    %21 = tpu.memref_slice %arg5[%c2_i32_12, %c0_i32_13] : memref<8x32xf32, #tpu.memory_space<vmem>> -> memref<1x32xf32, #tpu.memory_space<vmem>>
    %22 = tpu.memref_slice %arg6[%c2_i32_10] : memref<8x!tpu.dma_semaphore, #tpu.memory_space<semaphore_mem>> -> memref<1x!tpu.dma_semaphore, #tpu.memory_space<semaphore_mem>>
    %23 = tpu.memref_squeeze %22 : memref<1x!tpu.dma_semaphore, #tpu.memory_space<semaphore_mem>> -> memref<!tpu.dma_semaphore, #tpu.memory_space<semaphore_mem>>
    tpu.enqueue_dma source(%20 : memref<1x32xf32, #tpu.memory_space<any>>) target(%21 : memref<1x32xf32, #tpu.memory_space<vmem>>) target_semaphore(%23 : memref<!tpu.dma_semaphore, #tpu.memory_space<semaphore_mem>>)
    %c8_i32_14 = arith.constant 8 : i32
    %24 = arith.muli %arg0, %c8_i32_14 : i32
    %c3_i32 = arith.constant 3 : i32
    %25 = arith.addi %24, %c3_i32 : i32
    %26 = arith.index_cast %25 : i32 to index
    %27 = memref.load %arg1[%26] : memref<16xi32, #tpu.memory_space<smem>>
    %c3_i32_15 = arith.constant 3 : i32
    %c0_i32_16 = arith.constant 0 : i32
    %28 = tpu.memref_slice %arg2[%27, %c0_i32_16] : memref<64x32xf32, #tpu.memory_space<any>> -> memref<1x32xf32, #tpu.memory_space<any>>
    %c3_i32_17 = arith.constant 3 : i32
    %c0_i32_18 = arith.constant 0 : i32
    %29 = tpu.memref_slice %arg5[%c3_i32_17, %c0_i32_18] : memref<8x32xf32, #tpu.memory_space<vmem>> -> memref<1x32xf32, #tpu.memory_space<vmem>>
    %30 = tpu.memref_slice %arg6[%c3_i32_15] : memref<8x!tpu.dma_semaphore, #tpu.memory_space<semaphore_mem>> -> memref<1x!tpu.dma_semaphore, #tpu.memory_space<semaphore_mem>>
    %31 = tpu.memref_squeeze %30 : memref<1x!tpu.dma_semaphore, #tpu.memory_space<semaphore_mem>> -> memref<!tpu.dma_semaphore, #tpu.memory_space<semaphore_mem>>
    tpu.enqueue_dma source(%28 : memref<1x32xf32, #tpu.memory_space<any>>) target(%29 : memref<1x32xf32, #tpu.memory_space<vmem>>) target_semaphore(%31 : memref<!tpu.dma_semaphore, #tpu.memory_space<semaphore_mem>>)
    %c8_i32_19 = arith.constant 8 : i32
    %32 = arith.muli %arg0, %c8_i32_19 : i32
    %c4_i32 = arith.constant 4 : i32
    %33 = arith.addi %32, %c4_i32 : i32
    %34 = arith.index_cast %33 : i32 to index
    %35 = memref.load %arg1[%34] : memref<16xi32, #tpu.memory_space<smem>>
    %c4_i32_20 = arith.constant 4 : i32
    %c0_i32_21 = arith.constant 0 : i32
    %36 = tpu.memref_slice %arg2[%35, %c0_i32_21] : memref<64x32xf32, #tpu.memory_space<any>> -> memref<1x32xf32, #tpu.memory_space<any>>
    %c4_i32_22 = arith.constant 4 : i32
    %c0_i32_23 = arith.constant 0 : i32
    %37 = tpu.memref_slice %arg5[%c4_i32_22, %c0_i32_23] : memref<8x32xf32, #tpu.memory_space<vmem>> -> memref<1x32xf32, #tpu.memory_space<vmem>>
    %38 = tpu.memref_slice %arg6[%c4_i32_20] : memref<8x!tpu.dma_semaphore, #tpu.memory_space<semaphore_mem>> -> memref<1x!tpu.dma_semaphore, #tpu.memory_space<semaphore_mem>>
    %39 = tpu.memref_squeeze %38 : memref<1x!tpu.dma_semaphore, #tpu.memory_space<semaphore_mem>> -> memref<!tpu.dma_semaphore, #tpu.memory_space<semaphore_mem>>
    tpu.enqueue_dma source(%36 : memref<1x32xf32, #tpu.memory_space<any>>) target(%37 : memref<1x32xf32, #tpu.memory_space<vmem>>) target_semaphore(%39 : memref<!tpu.dma_semaphore, #tpu.memory_space<semaphore_mem>>)
    %c8_i32_24 = arith.constant 8 : i32
    %40 = arith.muli %arg0, %c8_i32_24 : i32
    %c5_i32 = arith.constant 5 : i32
    %41 = arith.addi %40, %c5_i32 : i32
    %42 = arith.index_cast %41 : i32 to index
    %43 = memref.load %arg1[%42] : memref<16xi32, #tpu.memory_space<smem>>
    %c5_i32_25 = arith.constant 5 : i32
    %c0_i32_26 = arith.constant 0 : i32
    %44 = tpu.memref_slice %arg2[%43, %c0_i32_26] : memref<64x32xf32, #tpu.memory_space<any>> -> memref<1x32xf32, #tpu.memory_space<any>>
    %c5_i32_27 = arith.constant 5 : i32
    %c0_i32_28 = arith.constant 0 : i32
    %45 = tpu.memref_slice %arg5[%c5_i32_27, %c0_i32_28] : memref<8x32xf32, #tpu.memory_space<vmem>> -> memref<1x32xf32, #tpu.memory_space<vmem>>
    %46 = tpu.memref_slice %arg6[%c5_i32_25] : memref<8x!tpu.dma_semaphore, #tpu.memory_space<semaphore_mem>> -> memref<1x!tpu.dma_semaphore, #tpu.memory_space<semaphore_mem>>
    %47 = tpu.memref_squeeze %46 : memref<1x!tpu.dma_semaphore, #tpu.memory_space<semaphore_mem>> -> memref<!tpu.dma_semaphore, #tpu.memory_space<semaphore_mem>>
    tpu.enqueue_dma source(%44 : memref<1x32xf32, #tpu.memory_space<any>>) target(%45 : memref<1x32xf32, #tpu.memory_space<vmem>>) target_semaphore(%47 : memref<!tpu.dma_semaphore, #tpu.memory_space<semaphore_mem>>)
    %c8_i32_29 = arith.constant 8 : i32
    %48 = arith.muli %arg0, %c8_i32_29 : i32
    %c6_i32 = arith.constant 6 : i32
    %49 = arith.addi %48, %c6_i32 : i32
    %50 = arith.index_cast %49 : i32 to index
    %51 = memref.load %arg1[%50] : memref<16xi32, #tpu.memory_space<smem>>
    %c6_i32_30 = arith.constant 6 : i32
    %c0_i32_31 = arith.constant 0 : i32
    %52 = tpu.memref_slice %arg2[%51, %c0_i32_31] : memref<64x32xf32, #tpu.memory_space<any>> -> memref<1x32xf32, #tpu.memory_space<any>>
    %c6_i32_32 = arith.constant 6 : i32
    %c0_i32_33 = arith.constant 0 : i32
    %53 = tpu.memref_slice %arg5[%c6_i32_32, %c0_i32_33] : memref<8x32xf32, #tpu.memory_space<vmem>> -> memref<1x32xf32, #tpu.memory_space<vmem>>
    %54 = tpu.memref_slice %arg6[%c6_i32_30] : memref<8x!tpu.dma_semaphore, #tpu.memory_space<semaphore_mem>> -> memref<1x!tpu.dma_semaphore, #tpu.memory_space<semaphore_mem>>
    %55 = tpu.memref_squeeze %54 : memref<1x!tpu.dma_semaphore, #tpu.memory_space<semaphore_mem>> -> memref<!tpu.dma_semaphore, #tpu.memory_space<semaphore_mem>>
    tpu.enqueue_dma source(%52 : memref<1x32xf32, #tpu.memory_space<any>>) target(%53 : memref<1x32xf32, #tpu.memory_space<vmem>>) target_semaphore(%55 : memref<!tpu.dma_semaphore, #tpu.memory_space<semaphore_mem>>)
    %c8_i32_34 = arith.constant 8 : i32
    %56 = arith.muli %arg0, %c8_i32_34 : i32
    %c7_i32 = arith.constant 7 : i32
    %57 = arith.addi %56, %c7_i32 : i32
    %58 = arith.index_cast %57 : i32 to index
    %59 = memref.load %arg1[%58] : memref<16xi32, #tpu.memory_space<smem>>
    %c7_i32_35 = arith.constant 7 : i32
    %c0_i32_36 = arith.constant 0 : i32
    %60 = tpu.memref_slice %arg2[%59, %c0_i32_36] : memref<64x32xf32, #tpu.memory_space<any>> -> memref<1x32xf32, #tpu.memory_space<any>>
    %c7_i32_37 = arith.constant 7 : i32
    %c0_i32_38 = arith.constant 0 : i32
    %61 = tpu.memref_slice %arg5[%c7_i32_37, %c0_i32_38] : memref<8x32xf32, #tpu.memory_space<vmem>> -> memref<1x32xf32, #tpu.memory_space<vmem>>
    %62 = tpu.memref_slice %arg6[%c7_i32_35] : memref<8x!tpu.dma_semaphore, #tpu.memory_space<semaphore_mem>> -> memref<1x!tpu.dma_semaphore, #tpu.memory_space<semaphore_mem>>
    %63 = tpu.memref_squeeze %62 : memref<1x!tpu.dma_semaphore, #tpu.memory_space<semaphore_mem>> -> memref<!tpu.dma_semaphore, #tpu.memory_space<semaphore_mem>>
    tpu.enqueue_dma source(%60 : memref<1x32xf32, #tpu.memory_space<any>>) target(%61 : memref<1x32xf32, #tpu.memory_space<vmem>>) target_semaphore(%63 : memref<!tpu.dma_semaphore, #tpu.memory_space<semaphore_mem>>)
    %c0_i32_39 = arith.constant 0 : i32
    %c8_i32_40 = arith.constant 8 : i32
    %64 = arith.addi %c0_i32_39, %c8_i32_40 : i32
    %c1_i32_41 = arith.constant 1 : i32
    scf.for %arg7 = %c0_i32_39 to %64 step %c1_i32_41  : i32 {
      %c8_i32_49 = arith.constant 8 : i32
      %c0_i32_50 = arith.constant 0 : i32
      %73 = arith.cmpi eq, %c8_i32_49, %c0_i32_50 : i32
      %c1_i32_51 = arith.constant 1 : i32
      %74 = arith.select %73, %c1_i32_51, %c8_i32_49 : i32
      %75 = arith.remsi %arg7, %74 : i32
      %c0_i32_52 = arith.constant 0 : i32
      %76 = arith.cmpi ne, %75, %c0_i32_52 : i32
      %c0_i32_53 = arith.constant 0 : i32
      %77 = arith.cmpi slt, %75, %c0_i32_53 : i32
      %c0_i32_54 = arith.constant 0 : i32
      %78 = arith.cmpi slt, %74, %c0_i32_54 : i32
      %79 = arith.xori %77, %78 : i1
      %80 = arith.andi %79, %76 : i1
      %81 = arith.addi %75, %74 : i32
      %82 = arith.select %80, %81, %75 : i32
      %c0_i32_55 = arith.constant 0 : i32
      %c0_i32_56 = arith.constant 0 : i32
      %83 = tpu.memref_slice %arg2[%c0_i32_55, %c0_i32_56] : memref<64x32xf32, #tpu.memory_space<any>> -> memref<1x32xf32, #tpu.memory_space<any>>
      %c0_i32_57 = arith.constant 0 : i32
      %84 = tpu.memref_slice %arg5[%arg7, %c0_i32_57] : memref<8x32xf32, #tpu.memory_space<vmem>> -> memref<1x32xf32, #tpu.memory_space<vmem>>
      %85 = tpu.memref_slice %arg6[%82] : memref<8x!tpu.dma_semaphore, #tpu.memory_space<semaphore_mem>> -> memref<1x!tpu.dma_semaphore, #tpu.memory_space<semaphore_mem>>
      %86 = tpu.memref_squeeze %85 : memref<1x!tpu.dma_semaphore, #tpu.memory_space<semaphore_mem>> -> memref<!tpu.dma_semaphore, #tpu.memory_space<semaphore_mem>>
      tpu.wait_dma2 semaphore(%86 : memref<!tpu.dma_semaphore, #tpu.memory_space<semaphore_mem>>) src(%83 : memref<1x32xf32, #tpu.memory_space<any>>) dst(%84 : memref<1x32xf32, #tpu.memory_space<vmem>>)
      %c8_i32_58 = arith.constant 8 : i32
      %87 = arith.addi %arg7, %c8_i32_58 : i32
      %c8_i32_59 = arith.constant 8 : i32
      %88 = arith.cmpi slt, %87, %c8_i32_59 : i32
      %89 = arith.extui %88 : i1 to i32
      %c0_i32_60 = arith.constant 0 : i32
      %90 = arith.cmpi ne, %89, %c0_i32_60 : i32
      scf.if %90 {
        %c8_i32_61 = arith.constant 8 : i32
        %91 = arith.addi %arg7, %c8_i32_61 : i32
        %c8_i32_62 = arith.constant 8 : i32
        %92 = arith.muli %arg0, %c8_i32_62 : i32
        %93 = arith.addi %92, %91 : i32
        %94 = arith.index_cast %93 : i32 to index
        %95 = memref.load %arg1[%94] : memref<16xi32, #tpu.memory_space<smem>>
        %c0_i32_63 = arith.constant 0 : i32
        %96 = tpu.memref_slice %arg2[%95, %c0_i32_63] : memref<64x32xf32, #tpu.memory_space<any>> -> memref<1x32xf32, #tpu.memory_space<any>>
        %c0_i32_64 = arith.constant 0 : i32
        %97 = tpu.memref_slice %arg5[%91, %c0_i32_64] : memref<8x32xf32, #tpu.memory_space<vmem>> -> memref<1x32xf32, #tpu.memory_space<vmem>>
        %98 = tpu.memref_slice %arg6[%82] : memref<8x!tpu.dma_semaphore, #tpu.memory_space<semaphore_mem>> -> memref<1x!tpu.dma_semaphore, #tpu.memory_space<semaphore_mem>>
        %99 = tpu.memref_squeeze %98 : memref<1x!tpu.dma_semaphore, #tpu.memory_space<semaphore_mem>> -> memref<!tpu.dma_semaphore, #tpu.memory_space<semaphore_mem>>
        tpu.enqueue_dma source(%96 : memref<1x32xf32, #tpu.memory_space<any>>) target(%97 : memref<1x32xf32, #tpu.memory_space<vmem>>) target_semaphore(%99 : memref<!tpu.dma_semaphore, #tpu.memory_space<semaphore_mem>>)
      } else {
      }
    }
    %c8_i32_42 = arith.constant 8 : i32
    %c0 = arith.constant 0 : index
    %c0_43 = arith.constant 0 : index
    %65 = vector.load %arg5[%c0, %c0_43] : memref<8x32xf32, #tpu.memory_space<vmem>>, vector<8x32xf32>
    %cst = arith.constant 5.65685415 : f32
    %66 = vector.broadcast %cst : f32 to vector<8x32xf32>
    %67 = arith.mulf %65, %66 : vector<8x32xf32>
    %c0_44 = arith.constant 0 : index
    %c0_45 = arith.constant 0 : index
    %68 = vector.load %arg3[%c0_44, %c0_45] : memref<8x32xf32, #tpu.memory_space<vmem>>, vector<8x32xf32>
    %69 = arith.addf %67, %68 : vector<8x32xf32>
    %c0_46 = arith.constant 0 : index
    %c0_47 = arith.constant 0 : index
    %c0_48 = arith.constant 0 : index
    %70 = vector.load %arg4[%c0_46, %c0_47, %c0_48] : memref<1x8x32xf32, #tpu.memory_space<vmem>>, vector<1x8x32xf32>
    %71 = vector.shape_cast %70 : vector<1x8x32xf32> to vector<8x32xf32>
    %72 = vector.shape_cast %69 : vector<8x32xf32> to vector<1x8x32xf32>
    tpu.vector_store %arg4[%c0_46, %c0_47, %c0_48], %72 {strides = array<i32>} : memref<1x8x32xf32, #tpu.memory_space<vmem>>, vector<1x8x32xf32>,
    return
  }
  func.func @transform_1(%arg0: i32, %arg1: memref<16xi32, #tpu.memory_space<smem>>) -> (i32, i32) {
    %c0_i32 = arith.constant 0 : i32
    %c0_i32_0 = arith.constant 0 : i32
    %c0_i32_1 = arith.constant 0 : i32
    return %c0_i32, %c0_i32_0 : i32, i32
  }
  func.func @transform_2(%arg0: i32, %arg1: memref<16xi32, #tpu.memory_space<smem>>) -> (i32, i32, i32) {
    %c0_i32 = arith.constant 0 : i32
    %c0_i32_0 = arith.constant 0 : i32
    %c0_i32_1 = arith.constant 0 : i32
    return %arg0, %c0_i32, %c0_i32_0 : i32, i32, i32
  }
}

</mosaic_0001>

<bundles_post_ra>
// kernel: tpu_custom_call.1
= control target key start
LH: loop header
LB: loop body
LE: loop exit
PB: predicated region body
PF: predicated region fallthrough
CT: control target
= control target key end

     0   :  { %s1145_s0 = inlined_call_operand.vmem [shape: s32[16], index: 0, kind: input, shape index: {}]   ;;  %s1146_s1 = inlined_call_operand.vmem [shape: f32[64,32], index: 1, kind: input, shape index: {}]   ;;  %s1147_s2 = inlined_call_operand.vmem [shape: f32[8,32], index: 2, kind: input, shape index: {}]   ;;  %s1148_s3 = inlined_call_operand.hbm [shape: f32[2,8,32], index: 3, kind: output, shape index: {}]  }
   0x1   :  { %s8_s14 = sshll.u32 %s1145_s0, 4  ;;  %s9_s14 = int_to_ptr.vmem [resolvable:$true] %s8_s14 }
   0x2   :  { %s894_s15 = scalar_lea.vmem %s9_s14, 16  ;;  %p899_p1 = scmp.lt.s32.totalorder %s9_s14, %s9_s14 }
   0x3   :  { %p895_p0 = scmp.ne.s32.totalorder %s9_s14, %s894_s15  ;;  %p900_p2 = scmp.lt.s32.totalorder %s894_s15, %s894_s15 }
   0x5   :  { %p901_p3 = por %p900_p2, %p899_p1 }
   0x7   :  { %p902_p4 = pnand %p901_p3, %p895_p0 }
   0x9   :  { %905 = shalt.err (!%p902_p4)  }
   0xa   :  { %s980_s16 = smov [#allocation5]  }
   0xb   :  { %11 = dma.vmem_to_smem %s9_s14, 16, %s980_s16, [#allocation4] }
   0xc   :  { %952 = dma.done.wait [#allocation4], 16 }
   0xd   :  { %953 = vsyncadd [#allocation4], 4294967280 }
   0xe   :  { %13 = sfence }
   0xf   :  { %14 = vsyncpa [#allocation7], 0 }
  0x10   :  { %16 = vsyncpa [#allocation7 + $0x1], 0  ;;  %s1005_s17 = smov 0   ;;  %s1007_s18 = smov 0  }
  0x11   :  { %s1009_s0 = smov 0   ;;  %s1011_s19 = smov 0  }
  0x12 LB: > { %s1026_s20 = sadd.s32 4294967295, %s974_s19   ;;  %s823_s21 = sadd.s32 4294967294, %s974_s19   ;;  %s974_s19 = sphi %s1011_s19, %s1154_s19   ;;  %s970_s0 = sphi %s1009_s0, %s1153_s0   ;;  %s966_s18 = sphi %s1007_s18, %s1152_s18   ;;  %s962_s17 = sphi %s1005_s17, %s1151_s17  }
  0x13   : > { %s1030_s22 = sadd.s32 1, %s974_s19   ;;  %s50_s23 = sadd.s32 1, %s970_s0 }
  0x14   : > { %s47_s24 = ssub.s32 %s974_s19, %s1030_s22  ;;  %p60_p5 = scmp.ne.s32.totalorder %s970_s0, %s966_s18 }
  0x15   : > { %p48_p6 = scmp.eq.s32.totalorder %s47_s24, 0  ;;  %p61_p7 = scmp.eq.s32.totalorder %s1026_s20, 1 }
  0x16   : > { %p66_p8 = scmp.ne.s32.totalorder %s966_s18, %s962_s17  ;;  %p67_p9 = scmp.eq.s32.totalorder %s823_s21, 1 }
  0x17   : > { %s1041_s25 = scalar_select %p48_p6, %s970_s0, %s50_s23  }
  0x18   : > { %p1043_p10 = por %p61_p7, %p60_p5  ;;  %p1047_p11 = por %p67_p9, %p66_p8 }
  0x19   : > { %p825_p12 = scmp.ge.s32.totalorder %s974_s19, 1  ;;  %p88_p13 = scmp.lt.s32.totalorder %s974_s19, 3 }
  0x1b   : > { %p89_p0 = pnand %p825_p12, %p88_p13 }
  0x1c   : > { %s100_s28 = sand.u32 (!%p89_p0), 1, %s966_s18   ;;  %s1055_s29 = sshll.u32 (!%p89_p0), %s1026_s20, 3 }
  0x1d   : > { %92 = sbr.rel (%p89_p0) target bundleno = 159 (0x9f), region = 24  ;;  %s1059_s30 = sshll.u32 (!%p89_p0), %s100_s28, 3 }
  0x1e   : > { %s104_s4 = sld [smem:[#allocation5 + %s1055_s29]] (!%p89_p0)  ;;  %s102_s8 = scalar_lea.vmem (!%p89_p0), [#allocation6], %s1059_s30 }
  0x24   : > { %s105_s7 = scalar_lea.vmem %s1146_s1, %s104_s4 }
  0x25   : > { %v124_v0 = vld [vmem:[%s105_s7] sm:$0x1] }
  0x26   : > { %125 = vst [vmem:[#allocation2] sm:$0x1] %v124_v0 }
  0x27   : > { %151 = vsyncadd [#allocation3], 16  ;;  %s152_s9 = sadd.s32 1, %s1055_s29 }
  0x28   : > { %s153_s10 = sld [smem:[#allocation5 + %s152_s9]] }
  0x2e   : > { %s154_s13 = scalar_lea.vmem %s1146_s1, %s153_s10 }
  0x2f   : > { %v175_v1 = vld [vmem:[%s154_s13] sm:$0x1] }
  0x30   : > { %176 = vst [vmem:[#allocation2 + $0x1] sm:$0x1] %v175_v1 }
  0x31   : > { %202 = vsyncadd [#allocation3 + $0x1], 16  ;;  %s203_s14 = sadd.s32 2, %s1055_s29 }
  0x32   : > { %s204_s15 = sld [smem:[#allocation5 + %s203_s14]] }
  0x38   : > { %s205_s23 = scalar_lea.vmem %s1146_s1, %s204_s15 }
  0x39   : > { %v226_v2 = vld [vmem:[%s205_s23] sm:$0x1] }
  0x3a   : > { %227 = vst [vmem:[#allocation2 + $0x2] sm:$0x1] %v226_v2 }
  0x3b   : > { %253 = vsyncadd [#allocation3 + $0x2], 16  ;;  %s254_s24 = sadd.s32 3, %s1055_s29 }
  0x3c   : > { %s255_s4 = sld [smem:[#allocation5 + %s254_s24]] }
  0x42   : > { %s256_s7 = scalar_lea.vmem %s1146_s1, %s255_s4 }
  0x43   : > { %v277_v3 = vld [vmem:[%s256_s7] sm:$0x1] }
  0x44   : > { %278 = vst [vmem:[#allocation2 + $0x3] sm:$0x1] %v277_v3 }
  0x45   : > { %304 = vsyncadd [#allocation3 + $0x3], 16  ;;  %s305_s9 = sadd.s32 4, %s1055_s29 }
  0x46   : > { %s306_s10 = sld [smem:[#allocation5 + %s305_s9]] }
  0x4c   : > { %s307_s13 = scalar_lea.vmem %s1146_s1, %s306_s10 }
  0x4d   : > { %v328_v4 = vld [vmem:[%s307_s13] sm:$0x1] }
  0x4e   : > { %329 = vst [vmem:[#allocation2 + $0x4] sm:$0x1] %v328_v4 }
  0x4f   : > { %355 = vsyncadd [#allocation3 + $0x4], 16  ;;  %s356_s14 = sadd.s32 5, %s1055_s29 }
  0x50   : > { %s357_s15 = sld [smem:[#allocation5 + %s356_s14]] }
  0x56   : > { %s358_s23 = scalar_lea.vmem %s1146_s1, %s357_s15 }
  0x57   : > { %v379_v5 = vld [vmem:[%s358_s23] sm:$0x1] }
  0x58   : > { %380 = vst [vmem:[#allocation2 + $0x5] sm:$0x1] %v379_v5 }
  0x59   : > { %406 = vsyncadd [#allocation3 + $0x5], 16  ;;  %s407_s24 = sadd.s32 6, %s1055_s29 }
  0x5a   : > { %s408_s4 = sld [smem:[#allocation5 + %s407_s24]] }
  0x60   : > { %s409_s7 = scalar_lea.vmem %s1146_s1, %s408_s4 }
  0x61   : > { %v430_v6 = vld [vmem:[%s409_s7] sm:$0x1] }
  0x62   : > { %431 = vst [vmem:[#allocation2 + $0x6] sm:$0x1] %v430_v6 }
  0x63   : > { %457 = vsyncadd [#allocation3 + $0x6], 16  ;;  %s458_s9 = sadd.s32 7, %s1055_s29 }
  0x64   : > { %s459_s10 = sld [smem:[#allocation5 + %s458_s9]] }
  0x6a   : > { %s460_s13 = scalar_lea.vmem %s1146_s1, %s459_s10 }
  0x6b   : > { %v481_v7 = vld [vmem:[%s460_s13] sm:$0x1] }
  0x6c   : > { %482 = vst [vmem:[#allocation2 + $0x7] sm:$0x1] %v481_v7 }
  0x6d   : > { %508 = vsyncadd [#allocation3 + $0x7], 16  ;;  %s1094_s14 = smov 0  }
  0x6e LB: >> { %p515_p1 = scmp.lt.s32.totalorder %s978_s14, 0  ;;  %s516_s15 = ssub.s32 0, %s978_s14  ;;  %s978_s14 = sphi %s1094_s14, %s514_s14  }
  0x6f   : >> { %s828_s16 = smin.u32 %s978_s14, %s516_s15 }
  0x70   : >> { %s518_s21 = sand.u32 7, %s828_s16  }
  0x71   : >> { %s519_s23 = ssub.s32 0, %s518_s21 }
  0x72   : >> { %s1156_s23 = smov (!%p515_p1, %s519_s23), %s518_s21 }
  0x73   : >> { %p830_p2 = scmp.lt.s32.totalorder %s1156_s23, 0  ;;  %s525_s24 = sadd.s32 8, %s1156_s23 }
  0x75   : >> { %s1158_s24 = smov (!%p830_p2, %s525_s24), %s1156_s23 }
  0x76   : >> { %s527_s4 = scalar_lea.sflag [#allocation3], %s1158_s24 }
  0x77   : >> { %954 = dma.done.wait %s527_s4, 16 }
  0x78   : >> { %955 = vsyncadd %s527_s4, 4294967280  ;;  %s531_s5 = sadd.s32 8, %s978_s14 }
  0x79   : >> { %p831_p3 = scmp.ge.s32.totalorder %s531_s5, 8 }
  0x7a   : >> { %s536_s6 = sadd.s32 (!%p831_p3), %s1055_s29, %s531_s5  ;;  %s718_s12 = scalar_lea.vmem (!%p831_p3), [#allocation2], %s978_s14 }
  0x7b   : >> { %535 = sbr.rel (%p831_p3) target bundleno = 133 (0x85), region = 275  ;;  %s537_s7 = sld [smem:[#allocation5 + %s536_s6]] (!%p831_p3) }
  0x81   : >> { %s538_s11 = scalar_lea.vmem %s1146_s1, %s537_s7 }
  0x82   : >> { %v558_v8 = vld [vmem:[%s538_s11] sm:$0x1] }
  0x83   : >> { %833 = vst [vmem:[%s718_s12 + $0x8] sm:$0x1] %v558_v8 }
  0x84   : >> { %585 = vsyncadd %s527_s4, 16 }
  0x85 PF: >> { %s514_s14 = sadd.s32 1, %s978_s14  }
  0x86   : >> { %p511_p4 = scmp.ge.s32.totalorder %s514_s14, 8  }
  0x87   : > { %v588_v10 = vld [vmem:[%s1147_s2] sm:$0xff] (%p511_p4)  ;;  %s835_s16 = sshll.u32 (%p511_p4), %s1026_s20, 7  ;;  %s606_s21 = sshll.u32 (%p511_p4), %s102_s8, 4  ;;  %vm590_vm0 = vcmask (%p511_p4), 261120   ;;  %s607_s21 = int_to_ptr.vmem [resolvable:$true] %s606_s21 }
  0x88   : > { %513 = sbr.rel (!%p511_p4) target bundleno = 110 (0x6e), region = 459  ;;  %s604_s14 = scalar_lea.hbm (%p511_p4), %s1148_s3, %s835_s16 }
  0x89   : > { %s593_s29 = scalar_lea.sflag (%p511_p4), [#allocation7], %s100_s28  ;;  %s906_s4 = scalar_lea.vmem (%p511_p4), %s607_s21, 128 }
  0x8a   : > { %v586_v9 = vld [vmem:[#allocation2] sm:$0xff] (%p511_p4)  ;;  %p907_p5 = scmp.ne.s32.totalorder (%p511_p4), %s607_s21, %s906_s4  ;;  %s981_s20 = smov (%p511_p4), [#allocation6]  }
  0x8b   : > { %v587_v11 = vmul.f32 (%p511_p4), 5.656854, %v586_v9  ;;  %s910_s5 = sshll.u32 (%p511_p4), %s981_s20, 4  ;;  %s911_s5 = int_to_ptr.vmem [resolvable:$false] %s910_s5 }
  0x8c   : > { %p908_p6 = pnand (%p511_p4), %p907_p5, %p1043_p10  ;;  %s912_s6 = scalar_lea.vmem (%p511_p4), %s911_s5, 256 }
  0x8d   : > { %v589_v12 = vadd.f32 %v588_v10, %v587_v11  ;;  %p913_p8 = scmp.lt.s32.totalorder %s607_s21, %s911_s5  ;;  %p914_p9 = scmp.lt.s32.totalorder %s912_s6, %s906_s4 }
  0x8e   : > { %p909_p7 = pneg %p908_p6 }
  0x8f   : > { %591 = vst.msk [vmem:[%s102_s8] sm:$0xff] %vm590_vm0, %v589_v12  ;;  %p915_p12 = por %p914_p9, %p913_p8 }
  0x91   : > { %p916_p13 = pnand %p915_p12, %p909_p7 }
  0x93   : > { %919 = shalt.err (!%p916_p13)
}
  0x94   : > { %s920_s7 = scalar_lea.hbm %s604_s14, 128  ;;  %s924_s8 = scalar_lea.hbm %s1148_s3, 256 }
  0x95   : > { %p921_p0 = scmp.ne.s32.totalorder %s604_s14, %s920_s7  ;;  %p925_p3 = scmp.lt.s32.totalorder %s604_s14, %s1148_s3 }
  0x96   : > { %p926_p4 = scmp.lt.s32.totalorder %s924_s8, %s920_s7 }
  0x97   : > { %p922_p1 = pnand %p921_p0, %p1043_p10 }
  0x98   : > { %p927_p5 = por %p926_p4, %p925_p3 }
  0x99   : > { %p923_p2 = pneg %p922_p1 }
  0x9b   : > { %p928_p6 = pnand %p927_p5, %p923_p2 }
  0x9d   : > { %931 = shalt.err (!%p928_p6)
}
  0x9e   : > { %846 = dma.vmem_to_hbm [thread:$0]  (%p1043_p10), %s607_s21, 128, %s604_s14, %s593_s29  }
  0x9f PF: > { %p852_p7 = scmp.ge.s32.totalorder %s974_s19, 2  ;;  %s618_s11 = sand.u32 1, %s962_s17  }
  0xa0   : > { %s619_s12 = scalar_lea.sflag [#allocation7], %s618_s11 }
  0xa1   : > { %p849_p8 = pnand %p852_p7, %p1047_p11 }
  0xa3   : > { %p850_p9 = pneg %p849_p8 }
  0xa5   : > { %957 = dma.done.wait (%p850_p9), %s619_s12, 128  }
  0xa6   : > { %959 = vsyncadd (%p850_p9), %s619_s12, 4294967168  ;;  %p19_p12 = scmp.ge.s32.totalorder %s1030_s22, 4   ;;  %s1151_s17 = smov %s966_s18 }
  0xa7   : > { %s1152_s18 = smov %s970_s0  ;;  %s1153_s0 = smov %s1041_s25 }
  0xa8   : > { %s1154_s19 = smov %s1030_s22  ;;  %21 = sbr.rel (!%p19_p12) target bundleno = 18 (0x12), region = 470 }
  0xad   :  { %624 = vsyncpa [#allocation7], 1 }
  0xae   :  { %626 = vsyncpa [#allocation7 + $0x1], 1 }
  0xaf   :  { %627 = vsyncmov [#allocation3] }
  0xb2   :  { %s628_s19 = vpop.sfrf %627 }
  0xb3   :  { %p838_p10 = scmp.ne.s32.totalorder %s628_s19, 0 }
  0xb5   :  { %632 = shalt.err (%p838_p10)  }
  0xb6   :  { %634 = vsyncmov [#allocation3 + $0x1] }
  0xb9   :  { %s635_s26 = vpop.sfrf %634 }
  0xba   :  { %p839_p11 = scmp.ne.s32.totalorder %s635_s26, 0 }
  0xbc   :  { %639 = shalt.err (%p839_p11)  }
  0xbd   :  { %641 = vsyncmov [#allocation3 + $0x2] }
  0xc0   :  { %s642_s27 = vpop.sfrf %641 }
  0xc1   :  { %p840_p13 = scmp.ne.s32.totalorder %s642_s27, 0 }
  0xc3   :  { %646 = shalt.err (%p840_p13)  }
  0xc4   :  { %648 = vsyncmov [#allocation3 + $0x3] }
  0xc7   :  { %s649_s13 = vpop.sfrf %648 }
  0xc8   :  { %p841_p0 = scmp.ne.s32.totalorder %s649_s13, 0 }
  0xca   :  { %653 = shalt.err (%p841_p0)  }
  0xcb   :  { %655 = vsyncmov [#allocation3 + $0x4] }
  0xce   :  { %s656_s22 = vpop.sfrf %655 }
  0xcf   :  { %p842_p1 = scmp.ne.s32.totalorder %s656_s22, 0 }
  0xd1   :  { %660 = shalt.err (%p842_p1)  }
  0xd2   :  { %662 = vsyncmov [#allocation3 + $0x5] }
  0xd5   :  { %s663_s1 = vpop.sfrf %662 }
  0xd6   :  { %p843_p2 = scmp.ne.s32.totalorder %s663_s1, 0 }
  0xd8   :  { %667 = shalt.err (%p843_p2)  }
  0xd9   :  { %669 = vsyncmov [#allocation3 + $0x6] }
  0xdc   :  { %s670_s2 = vpop.sfrf %669 }
  0xdd   :  { %p844_p3 = scmp.ne.s32.totalorder %s670_s2, 0 }
  0xdf   :  { %674 = shalt.err (%p844_p3)  }
  0xe0   :  { %676 = vsyncmov [#allocation3 + $0x7] }
  0xe3   :  { %s677_s3 = vpop.sfrf %676 }
  0xe4   :  { %p845_p4 = scmp.ne.s32.totalorder %s677_s3, 0 }
  0xe6   :  { %681 = shalt.err (%p845_p4)  }

</bundles_post_ra>
